<compile_context>
chip_gen: v7x
topology: tpu7x:2x2x1
jax: 0.10.0
libtpu: 0.0.40
codegen_flags: <defaults>
</compile_context>

<pallas_src>
import functools

import jax
import jax.numpy as jnp
from jax.experimental import pallas as pl
from jax.experimental.pallas import tpu as pltpu


def _img_ch_layernorm_kernel(x_ref, w_ref, b_ref, o_ref, *, inv_c: float,
                             eps: float, bf16_tail: bool):
    # x block: (1, C, T_TILE, 128); w/b blocks: (1, C, 1, 1)
    x = x_ref[...]
    xf = x.astype(jnp.float32)

    # Channel statistics in f32 (two-pass, numerically robust).
    u = jnp.sum(xf, axis=1, keepdims=True) * inv_c          # mean over C
    d = xf - u
    s = jnp.sum(d * d, axis=1, keepdims=True) * inv_c       # biased variance
    r = jax.lax.rsqrt(s + eps)

    if bf16_tail:
        # bf16 elementwise tail + store (v6e/v7x bf16 VALU); stats stay f32.
        y = (x - u.astype(jnp.bfloat16)) * r.astype(jnp.bfloat16)
        o_ref[...] = (w_ref[...].astype(jnp.bfloat16) * y
                      + b_ref[...].astype(jnp.bfloat16)).astype(o_ref.dtype)
    else:
        y = d * r
        o_ref[...] = (w_ref[...].astype(jnp.float32) * y
                      + b_ref[...].astype(jnp.float32)).astype(o_ref.dtype)


def _physical_vmem_bytes() -> int:
    try:
        return int(pltpu.get_tpu_info().vmem_capacity_bytes)
    except Exception:
        return 64 * 1024 * 1024   # conservative: v7x per-TensorCore VMEM


def img_ch_layernorm(x: jax.Array, weight: jax.Array, bias: jax.Array,
                     eps: float = 1e-5,
                     target_block_bytes: int = 6 * 1024 * 1024) -> jax.Array:
    """Channel-wise LayerNorm of an NCHW tensor (PyTorch ImgChLayerNorm)."""
    B, C, H, W = x.shape
    assert weight.shape == (C,) and bias.shape == (C,)

    itemsize = x.dtype.itemsize
    S = H * W
    full_t = pl.cdiv(S, 128)          # dense 128-lane rows covering S
    s_pad = full_t * 128              # pad only to lane granularity

    # ---- generation-aware VMEM budget ------------------------------------
    vmem_cap = _physical_vmem_bytes()
    # ~3/4 of physical VMEM, capped at 96 MiB: 96 MiB on v5e/v6e, 48 MiB v7x.
    vmem_limit = min(vmem_cap * 3 // 4, 96 * 1024 * 1024)
    # Per-block budget ~1/12 of the scoped limit: room for 2x input + 2x
    # output double buffers plus the f32 astype/diff temporaries (which are
    # 2x the block size when the input is bf16).
    block_budget = min(target_block_bytes, vmem_limit // 12)

    row_bytes = C * 128 * itemsize
    max_t = max(8, (block_budget // row_bytes) // 8 * 8)

    if full_t <= max_t:
        t_tile = full_t               # block dim == array dim -> always legal
    else:
        t_tile = max_t                # multiple of 8; last block may be
                                      # partial (OOB reads harmless, OOB
                                      # writes dropped)
    grid_s = pl.cdiv(full_t, t_tile)

    # v7x megacore: ensure >= 2 total grid steps so both TensorCores get work
    # (v5e/v6e are single-TC, so this split is free there).
    if B * grid_s < 2 and full_t > 8:
        t_tile = ((pl.cdiv(full_t, 2) + 7) // 8) * 8
        grid_s = pl.cdiv(full_t, t_tile)

    # Large-C fallback: a minimal (1, C, 8, 128) block may exceed the default
    # budget -> raise the scoped limit toward physical VMEM.
    block_bytes = C * t_tile * 128 * itemsize
    if 5 * block_bytes > vmem_limit:
        vmem_limit = min(8 * block_bytes, vmem_cap * 15 // 16)
    if 5 * block_bytes > vmem_limit:
        # TODO(synk): for very deep C, split the channel axis over an
        # "arbitrary" grid dimension with sum/sumsq accumulators in scratch.
        raise ValueError(
            f"ImgChLayerNorm block ({block_bytes} bytes) does not fit VMEM "
            f"({vmem_cap} bytes physical); C={C} needs a channel-split kernel.")

    # ---- lane-dense spatial layout ----------------------------------------
    x3 = x.reshape(B, C, S)
    if s_pad != S:
        # Rare ragged-lane case (S % 128 != 0): zero-pad the spatial tail.
        # Common case (S % 128 == 0) is a free reshape, no extra HBM pass.
        x3 = jnp.pad(x3, ((0, 0), (0, 0), (0, s_pad - S)))
    x4 = x3.reshape(B, C, full_t, 128)

    w4 = weight.reshape(1, C, 1, 1)
    b4 = bias.reshape(1, C, 1, 1)

    kernel = functools.partial(
        _img_ch_layernorm_kernel,
        inv_c=1.0 / C, eps=float(eps),
        bf16_tail=bool(x.dtype == jnp.bfloat16))

    grid = (B, grid_s)
    x_spec = pl.BlockSpec((1, C, t_tile, 128), lambda b, s: (b, 0, s, 0))
    # Constant block index -> params DMA'd once, resident across grid steps.
    p_spec = pl.BlockSpec((1, C, 1, 1), lambda b, s: (0, 0, 0, 0))
    # Note: on v7x, pipeline_mode=pl.Buffered(3) on x_spec/out_spec is a
    # further low-single-digit-% option once blocks are large; omitted here.

    out4 = pl.pallas_call(
        kernel,
        out_shape=jax.ShapeDtypeStruct((B, C, full_t, 128), x.dtype),
        grid_spec=pltpu.PrefetchScalarGridSpec(
            num_scalar_prefetch=0,
            grid=grid,
            in_specs=[x_spec, p_spec, p_spec],
            out_specs=x_spec,
        ),
        compiler_params=pltpu.CompilerParams(
            dimension_semantics=("parallel", "parallel"),
            vmem_limit_bytes=int(vmem_limit)),
    )(x4, w4, b4)

    out3 = out4.reshape(B, C, s_pad)
    if s_pad != S:
        out3 = out3[:, :, :S]
    return out3.reshape(B, C, H, W)


def _reference(x, weight, bias, eps=1e-5):
    x = x.astype(jnp.float32)
    u = jnp.mean(x, axis=1, keepdims=True)
    s = jnp.mean((x - u) ** 2, axis=1, keepdims=True)
    y = (x - u) / jnp.sqrt(s + eps)
    return (weight[None, :, None, None].astype(jnp.float32) * y
            + bias[None, :, None, None].astype(jnp.float32))


if __name__ == "__main__":
    key = jax.random.PRNGKey(0)
    kx, kw, kb, kx2, kx3, kx4, kw4, kb4 = jax.random.split(key, 8)

    # Case 1: shapes implied by the module spec (B=2, C=4, 16x16 spatial).
    B, C, H, W = 2, 4, 16, 16
    x = jax.random.normal(kx, (B, C, H, W), dtype=jnp.float32)
    weight = 1.0 + 0.1 * jax.random.normal(kw, (C,), dtype=jnp.float32)
    bias = 0.1 * jax.random.normal(kb, (C,), dtype=jnp.float32)
    out = jax.block_until_ready(img_ch_layernorm(x, weight, bias, eps=1e-5))
    ref = _reference(x, weight, bias, eps=1e-5)
    assert out.shape == (B, C, H, W)
    assert jnp.allclose(out, ref, atol=1e-5, rtol=1e-5)

    # Case 2: odd spatial size -> exercises the ragged 128-lane pad/slice path.
    B2, C2, H2, W2 = 1, 3, 7, 9
    x2 = jax.random.normal(kx2, (B2, C2, H2, W2), dtype=jnp.float32)
    w2 = jnp.ones((C2,), dtype=jnp.float32)
    b2 = jnp.zeros((C2,), dtype=jnp.float32)
    out2 = jax.block_until_ready(img_ch_layernorm(x2, w2, b2, eps=1e-5))
    ref2 = _reference(x2, w2, b2, eps=1e-5)
    assert out2.shape == (B2, C2, H2, W2)
    assert jnp.allclose(out2, ref2, atol=1e-5, rtol=1e-5)

    # Case 3: small block budget -> multiple spatial tiles with a partial
    # last block (full_t=20, t_tile=8), no pad path (S % 128 == 0).
    B3, C3, H3, W3 = 1, 4, 40, 64
    x3 = jax.random.normal(kx3, (B3, C3, H3, W3), dtype=jnp.float32)
    w3 = 1.0 + 0.05 * jax.random.normal(kw, (C3,), dtype=jnp.float32)
    b3 = 0.05 * jax.random.normal(kb, (C3,), dtype=jnp.float32)
    out3 = jax.block_until_ready(
        img_ch_layernorm(x3, w3, b3, eps=1e-5, target_block_bytes=20000))
    ref3 = _reference(x3, w3, b3, eps=1e-5)
    assert out3.shape == (B3, C3, H3, W3)
    assert jnp.allclose(out3, ref3, atol=1e-5, rtol=1e-5)

    # Case 4: bf16 input -> f32 stats, bf16 elementwise tail + store.
    B4, C4, H4, W4 = 2, 8, 32, 64
    x4 = jax.random.normal(kx4, (B4, C4, H4, W4), dtype=jnp.bfloat16)
    w4 = 1.0 + 0.1 * jax.random.normal(kw4, (C4,), dtype=jnp.float32)
    b4 = 0.1 * jax.random.normal(kb4, (C4,), dtype=jnp.float32)
    out4 = jax.block_until_ready(img_ch_layernorm(x4, w4, b4, eps=1e-5))
    ref4 = _reference(x4, w4, b4, eps=1e-5)
    assert out4.shape == (B4, C4, H4, W4)
    assert jnp.allclose(out4.astype(jnp.float32), ref4, atol=6e-2, rtol=5e-2)

    print("KERNEL_OK")
</pallas_src>

<mosaic_0001>
module attributes {stable_mosaic.version = 11 : i64} {
  func.func @_img_ch_layernorm_kernel(%arg0: i32, %arg1: i32, %arg2: memref<1x4x2x128xf32, #tpu.memory_space<vmem>>, %arg3: memref<1x4x1x1xf32, #tpu.memory_space<vmem>>, %arg4: memref<1x4x1x1xf32, #tpu.memory_space<vmem>>, %arg5: memref<1x4x2x128xf32, #tpu.memory_space<vmem>>) attributes {dimension_semantics = [#tpu.dimension_semantics<parallel>, #tpu.dimension_semantics<parallel>], iteration_bounds = array<i64: 2, 1>, scalar_prefetch = 0 : i64, scratch_operands = 0 : i64, tpu.core_type = #tpu.core_type<tc>, window_params = [{transform_indices = @transform_0, window_bounds = array<i64: 1, 4, 2, 128>}, {pipeline_mode = #tpu.pipeline_mode<synchronous>, transform_indices = @transform_1, window_bounds = array<i64: 1, 4, 1, 1>}, {pipeline_mode = #tpu.pipeline_mode<synchronous>, transform_indices = @transform_2, window_bounds = array<i64: 1, 4, 1, 1>}, {transform_indices = @transform_3, window_bounds = array<i64: 1, 4, 2, 128>}]} {
    %c0 = arith.constant 0 : index
    %c0_0 = arith.constant 0 : index
    %c0_1 = arith.constant 0 : index
    %c0_2 = arith.constant 0 : index
    %0 = vector.load %arg2[%c0, %c0_0, %c0_1, %c0_2] : memref<1x4x2x128xf32, #tpu.memory_space<vmem>>, vector<1x4x2x128xf32>
    %cst = arith.constant dense<0.000000e+00> : vector<1x2x128xf32>
    %1 = vector.multi_reduction <add>, %0, %cst [1] : vector<1x4x2x128xf32> to vector<1x2x128xf32>
    %2 = vector.shape_cast %1 : vector<1x2x128xf32> to vector<1x1x2x128xf32>
    %cst_3 = arith.constant 2.500000e-01 : f32
    %3 = vector.broadcast %cst_3 : f32 to vector<1x1x2x128xf32>
    %4 = arith.mulf %2, %3 : vector<1x1x2x128xf32>
    %5 = vector.broadcast %4 : vector<1x1x2x128xf32> to vector<1x4x2x128xf32>
    %6 = arith.subf %0, %5 : vector<1x4x2x128xf32>
    %7 = arith.mulf %6, %6 : vector<1x4x2x128xf32>
    %cst_4 = arith.constant dense<0.000000e+00> : vector<1x2x128xf32>
    %8 = vector.multi_reduction <add>, %7, %cst_4 [1] : vector<1x4x2x128xf32> to vector<1x2x128xf32>
    %9 = vector.shape_cast %8 : vector<1x2x128xf32> to vector<1x1x2x128xf32>
    %cst_5 = arith.constant 2.500000e-01 : f32
    %10 = vector.broadcast %cst_5 : f32 to vector<1x1x2x128xf32>
    %11 = arith.mulf %9, %10 : vector<1x1x2x128xf32>
    %cst_6 = arith.constant 9.99999974E-6 : f32
    %12 = vector.broadcast %cst_6 : f32 to vector<1x1x2x128xf32>
    %13 = arith.addf %11, %12 : vector<1x1x2x128xf32>
    %14 = math.rsqrt %13 : vector<1x1x2x128xf32>
    %15 = vector.broadcast %14 : vector<1x1x2x128xf32> to vector<1x4x2x128xf32>
    %16 = arith.mulf %6, %15 : vector<1x4x2x128xf32>
    %c0_7 = arith.constant 0 : index
    %c0_8 = arith.constant 0 : index
    %c0_9 = arith.constant 0 : index
    %c0_10 = arith.constant 0 : index
    %17 = vector.load %arg3[%c0_7, %c0_8, %c0_9, %c0_10] : memref<1x4x1x1xf32, #tpu.memory_space<vmem>>, vector<1x4x1x1xf32>
    %18 = vector.broadcast %17 : vector<1x4x1x1xf32> to vector<1x4x2x128xf32>
    %19 = arith.mulf %18, %16 : vector<1x4x2x128xf32>
    %c0_11 = arith.constant 0 : index
    %c0_12 = arith.constant 0 : index
    %c0_13 = arith.constant 0 : index
    %c0_14 = arith.constant 0 : index
    %20 = vector.load %arg4[%c0_11, %c0_12, %c0_13, %c0_14] : memref<1x4x1x1xf32, #tpu.memory_space<vmem>>, vector<1x4x1x1xf32>
    %21 = vector.broadcast %20 : vector<1x4x1x1xf32> to vector<1x4x2x128xf32>
    %22 = arith.addf %19, %21 : vector<1x4x2x128xf32>
    %c0_15 = arith.constant 0 : index
    %c0_16 = arith.constant 0 : index
    %c0_17 = arith.constant 0 : index
    %c0_18 = arith.constant 0 : index
    %23 = vector.load %arg5[%c0_15, %c0_16, %c0_17, %c0_18] : memref<1x4x2x128xf32, #tpu.memory_space<vmem>>, vector<1x4x2x128xf32>
    tpu.vector_store %arg5[%c0_15, %c0_16, %c0_17, %c0_18], %22 {strides = array<i32>} : memref<1x4x2x128xf32, #tpu.memory_space<vmem>>, vector<1x4x2x128xf32>,
    return
  }
  func.func @transform_0(%arg0: i32, %arg1: i32) -> (i32, i32, i32, i32) {
    %c0_i32 = arith.constant 0 : i32
    %c0_i32_0 = arith.constant 0 : i32
    %c0_i32_1 = arith.constant 0 : i32
    return %arg0, %c0_i32, %arg1, %c0_i32_0 : i32, i32, i32, i32
  }
  func.func @transform_1(%arg0: i32, %arg1: i32) -> (i32, i32, i32, i32) {
    %c0_i32 = arith.constant 0 : i32
    %c0_i32_0 = arith.constant 0 : i32
    %c0_i32_1 = arith.constant 0 : i32
    %c0_i32_2 = arith.constant 0 : i32
    %c0_i32_3 = arith.constant 0 : i32
    return %c0_i32, %c0_i32_0, %c0_i32_1, %c0_i32_2 : i32, i32, i32, i32
  }
  func.func @transform_2(%arg0: i32, %arg1: i32) -> (i32, i32, i32, i32) {
    %c0_i32 = arith.constant 0 : i32
    %c0_i32_0 = arith.constant 0 : i32
    %c0_i32_1 = arith.constant 0 : i32
    %c0_i32_2 = arith.constant 0 : i32
    %c0_i32_3 = arith.constant 0 : i32
    return %c0_i32, %c0_i32_0, %c0_i32_1, %c0_i32_2 : i32, i32, i32, i32
  }
  func.func @transform_3(%arg0: i32, %arg1: i32) -> (i32, i32, i32, i32) {
    %c0_i32 = arith.constant 0 : i32
    %c0_i32_0 = arith.constant 0 : i32
    %c0_i32_1 = arith.constant 0 : i32
    return %arg0, %c0_i32, %arg1, %c0_i32_0 : i32, i32, i32, i32
  }
}

</mosaic_0001>

<bundles_post_ra>
// kernel: tpu_custom_call.1
= control target key start
LH: loop header
LB: loop body
LE: loop exit
PB: predicated region body
PF: predicated region fallthrough
CT: control target
= control target key end

     0   :  { %8 = vsyncpa [#allocation3], 0  ;;  %s881_s0 = inlined_call_operand.hbm [shape: f32[2,4,2,128], index: 0, kind: input, shape index: {}]   ;;  %s882_s1 = inlined_call_operand.vmem [shape: f32[1,4,1,1], index: 1, kind: input, shape index: {}]   ;;  %s883_s2 = inlined_call_operand.vmem [shape: f32[1,4,1,1], index: 2, kind: input, shape index: {}]   ;;  %s884_s3 = inlined_call_operand.hbm [shape: f32[2,4,2,128], index: 3, kind: output, shape index: {}]  }
   0x1   :  { %10 = vsyncpa [#allocation3 + $0x1], 0 }
   0x2   :  { %11 = vsyncpa [#allocation4], 0 }
   0x3   :  { %13 = vsyncpa [#allocation4 + $0x1], 0  ;;  %s670_s12 = smov 0   ;;  %s672_s13 = smov 0  }
   0x4   :  { %s674_s14 = smov 0   ;;  %s676_s15 = smov 0  }
   0x5   :  { %s678_s16 = smov 0   ;;  %s680_s17 = smov 0  }
   0x6 LB: > { %s433_s18 = sadd.s32 4294967295, %s641_s17   ;;  %s434_s19 = sadd.s32 4294967294, %s641_s17   ;;  %s641_s17 = sphi %s680_s17, %s19_s17   ;;  %s637_s16 = sphi %s678_s16, %s899_s16   ;;  %s633_s15 = sphi %s676_s15, %s898_s15   ;;  %s629_s14 = sphi %s674_s14, %s897_s14   ;;  %s625_s13 = sphi %s672_s13, %s896_s13   ;;  %s621_s12 = sphi %s670_s12, %s895_s12  }
   0x7   : > { %s31_s20 = sadd.s32 1, %s637_s16  ;;  %s40_s21 = sadd.s32 1, %s629_s14 }
   0x8   : > { %p33_p0 = scmp.ge.s32.totalorder %s31_s20, 2  ;;  %p47_p1 = scmp.ne.s32.totalorder %s629_s14, %s625_s13 }
   0x9   : > { %p48_p2 = scmp.eq.s32.totalorder %s641_s17, 0  ;;  %p53_p3 = scmp.ne.s32.totalorder %s625_s13, %s621_s12 }
   0xa   : > { %s901_s20 = smov (%p33_p0, %s31_s20), 0  ;;  %p54_p5 = scmp.eq.s32.totalorder %s433_s18, 0 }
   0xb   : > { %p711_p4 = por %p48_p2, %p47_p1  ;;  %s35_s23 = ssub.s32 %s637_s16, %s901_s20 }
   0xc   : > { %p121_p6 = scmp.eq.s32.totalorder %s433_s18, 1  ;;  %p38_p7 = scmp.eq.s32.totalorder %s35_s23, 0 }
   0xd   : > { %p717_p8 = por %p54_p5, %p53_p3  ;;  %p127_p10 = scmp.eq.s32.totalorder %s434_s19, 1 }
   0xe   : > { %p721_p9 = por %p121_p6, %p47_p1  ;;  %p470_p13 = scmp.lt.s32.totalorder %s641_s17, 2 }
   0xf   : > { %s726_s26 = scalar_select %p38_p7, %s629_s14, %s40_s21  }
  0x10   : > { %s888_s25 = scalar_select %p721_p9, 1, 0 }
  0x11   : > { %p728_p11 = por %p127_p10, %p53_p3  ;;  %s153_s28 = sand.u32 1, %s629_s14  }
  0x12   : > { %s437_s29 = sshll.u32 %s153_s28, 3  ;;  %s456_s30 = sshll.u32 %s637_s16, 7 }
  0x13   : > { %s889_s27 = scalar_select %p728_p11, 1, 0 }
  0x14   : > { %s739_s6 = scalar_lea.hbm %s881_s0, %s456_s30  ;;  %s157_s7 = scalar_lea.vmem [#allocation2], %s437_s29 }
  0x15   : > { %s165_s8 = sshll.u32 %s157_s7, 4  ;;  %p745_p0 = pnand %p470_p13, %p711_p4  ;;  %s741_s8 = int_to_ptr.vmem [resolvable:$true] %s165_s8 }
  0x16   : > { %s750_s10 = scalar_lea.sflag [#allocation3], %s153_s28  ;;  %s529_s11 = scalar_lea.hbm %s739_s6, 128 }
  0x17   : > { %p530_p2 = scmp.ne.s32.totalorder %s739_s6, %s529_s11  ;;  %p531_p3 = pneg %p745_p0 }
  0x18   : > { %s534_s21 = scalar_lea.hbm %s881_s0, 256  ;;  %p535_p4 = scmp.lt.u32.totalorder %s739_s6, %s881_s0 }
  0x19   : > { %p532_p5 = pnand %p531_p3, %p530_p2  ;;  %p536_p7 = scmp.lt.u32.totalorder %s534_s21, %s529_s11 }
  0x1a   : > { %p538_p13 = scmp.lt.u32.totalorder %s529_s11, %s739_s6 }
  0x1b   : > { %p533_p6 = pneg %p532_p5  ;;  %p537_p10 = por %p536_p7, %p535_p4 }
  0x1d   : > { %p539_p12 = por %p538_p13, %p537_p10 }
  0x1f   : > { %p540_p1 = pnand %p539_p12, %p533_p6 }
  0x21   : > { %543 = shalt.err (!%p540_p1)
}
  0x22   : > { %s544_s28 = scalar_lea.vmem %s741_s8, 128  ;;  %s643_s29 = smov [#allocation2]  }
  0x23   : > { %p545_p2 = scmp.ne.s32.totalorder %s741_s8, %s544_s28  ;;  %s549_s30 = sshll.u32 %s643_s29, 4  ;;  %s550_s30 = int_to_ptr.vmem [resolvable:$false] %s549_s30 }
  0x24   : > { %s551_s4 = scalar_lea.vmem %s550_s30, 256  ;;  %p552_p9 = scmp.lt.s32.totalorder %s741_s8, %s550_s30 }
  0x25   : > { %p547_p5 = pnand %p545_p2, %p531_p3  ;;  %p553_p4 = scmp.lt.s32.totalorder %s551_s4, %s544_s28 }
  0x27   : > { %p548_p11 = pneg %p547_p5  ;;  %p554_p7 = por %p553_p4, %p552_p9 }
  0x29   : > { %p555_p10 = pnand %p554_p7, %p548_p11 }
  0x2b   : > { %558 = shalt.err (!%p555_p10)
}
  0x2c   : > { %s644_s5 = smov 32   ;;  %s645_s7 = smov 2  }
  0x2d   : > { %465 = dma.hbm_to_vmem [thread:$0]  (!%p745_p0), %s739_s6, 128, %s741_s8, %s750_s10, %s644_s5, %s644_s5, %s645_s7  }
  0x2e   : > { %p173_p12 = scmp.lt.s32.totalorder %s641_s17, 3  ;;  %p891_p1 = scmp.ge.s32.totalorder %s641_s17, 1 }
  0x30   : > { %p174_p3 = pnand %p891_p1, %p173_p12 }
  0x31   : > { %s782_s11 = sand.u32 (!%p174_p3), 1, %s625_s13  }
  0x32   : > { %177 = sbr.rel (%p174_p3) target bundleno = 217 (0xd9), region = 32  ;;  %s441_s18 = sshll.u32 (!%p174_p3), %s782_s11, 3 }
  0x33   : > { %s180_s19 = scalar_lea.sflag (!%p174_p3), [#allocation3], %s782_s11  ;;  %s183_s21 = scalar_lea.vmem (!%p174_p3), [#allocation2], %s441_s18 }
  0x39   : > { %612 = dma.done.wait (%p717_p8), %s180_s19, 128  }
  0x3a   : > { %614 = vsyncadd (%p717_p8), %s180_s19, 4294967168  ;;  %v646_v0 = vmov 0   ;;  %v445_v1 = vld [vmem:[%s882_s1 + $0x2] ss:$0 sm:$0xff]  ;;  %v443_v2 = vld [vmem:[%s882_s1] ss:$0 sm:$0xff] }
  0x3b   : > { %526 = vset.pattern.permute.xlu1 %v646_v0  ;;  %525 = vset.pattern.permute.xlu0 %v646_v0  ;;  %v446_v3 = vld [vmem:[%s882_s1 + $0x3] ss:$0 sm:$0xff]  ;;  %v444_v4 = vld [vmem:[%s882_s1 + $0x1] ss:$0 sm:$0xff]  ;;  %v447_v6 = vld [vmem:[%s883_s2] ss:$0 sm:$0xff] }
  0x3c   : > { %274 = vperm.xlu1 %526, %v445_v1   ;;  %266 = vperm.xlu0 %525, %v443_v2   ;;  %v448_v5 = vld [vmem:[%s883_s2 + $0x1] ss:$0 sm:$0xff]  ;;  %v450_v7 = vld [vmem:[%s883_s2 + $0x3] ss:$0 sm:$0xff]  ;;  %v449_v8 = vld [vmem:[%s883_s2 + $0x2] ss:$0 sm:$0xff] }
  0x3d   : > { %vm210_vm0 = vcmask 1041408   ;;  %v206_v9 = vld [vmem:[%s183_s21] sm:$0x3]  ;;  %v207_v10 = vld [vmem:[%s183_s21 + $0x2] sm:$0x3]  ;;  %s457_s10 = sshll.u32 %s633_s15, 7 }
  0x3e   : > { %v211_v11 = vsel %vm210_vm0, %v206_v9, 0.0  ;;  %v212_v12 = vsel %vm210_vm0, %v207_v10, 0.0  ;;  %v208_v13 = vld [vmem:[%s183_s21 + $0x4] sm:$0x3]  ;;  %v209_v16 = vld [vmem:[%s183_s21 + $0x6] sm:$0x3]  ;;  %s832_s23 = scalar_lea.hbm %s884_s3, %s457_s10 }
  0x3f   : > { %v213_v14 = vadd.f32 %v212_v12, %v211_v11  ;;  %v214_v15 = vsel %vm210_vm0, %v208_v13, 0.0  ;;  %v216_v18 = vsel %vm210_vm0, %v209_v16, 0.0  ;;  %s205_s21 = scalar_lea.vmem [#allocation5], %s441_s18  ;;  %s334_s15 = scalar_lea.sflag [#allocation4], %s782_s11 }
  0x40   : > { %278 = vperm.xlu1 %526, %v446_v3   ;;  %270 = vperm.xlu0 %525, %v444_v4   ;;  %s348_s9 = sshll.u32 %s205_s21, 4  ;;  %p892_p9 = scmp.ne.s32.totalorder %s888_s25, 0  ;;  %s827_s9 = int_to_ptr.vmem [resolvable:$true] %s348_s9 }
  0x41   : > { %v215_v17 = vadd.f32 %v214_v15, %v213_v14  ;;  %s559_s28 = scalar_lea.vmem %s827_s9, 128  ;;  %s647_s24 = smov [#allocation5]  }
  0x42   : > { %p560_p8 = scmp.ne.s32.totalorder %s827_s9, %s559_s28  ;;  %s563_s29 = sshll.u32 %s647_s24, 4  ;;  %s564_s29 = int_to_ptr.vmem [resolvable:$false] %s563_s29 }
  0x43   : > { %v217_v19 = vadd.f32 %v216_v18, %v215_v17  ;;  %s565_s30 = scalar_lea.vmem %s564_s29, 256  ;;  %p566_p6 = scmp.lt.s32.totalorder %s827_s9, %s564_s29 }
  0x44   : > { %314 = vperm.xlu1 %526, %v448_v5   ;;  %310 = vperm.xlu0 %525, %v447_v6   ;;  %p561_p11 = pnand %p560_p8, %p892_p9  ;;  %p567_p13 = scmp.lt.s32.totalorder %s565_s30, %s559_s28 }
  0x45   : > { %v218_v20 = vmul.f32 0.25, %v217_v19 }
  0x46   : > { %p562_p0 = pneg %p561_p11  ;;  %p568_p2 = por %p567_p13, %p566_p6 }
  0x47   : > { %v219_v21 = vsub.f32 %v206_v9, %v218_v20  ;;  %v220_v22 = vsub.f32 %v207_v10, %v218_v20  ;;  %v221_v23 = vsub.f32 %v208_v13, %v218_v20  ;;  %v222_v26 = vsub.f32 %v209_v16, %v218_v20 }
  0x48   : > { %322 = vperm.xlu1 %526, %v450_v7   ;;  %318 = vperm.xlu0 %525, %v449_v8   ;;  %p569_p5 = pnand %p568_p2, %p562_p0 }
  0x49   : > { %v223_v24 = vmul.f32 %v219_v21, %v219_v21  ;;  %v224_v25 = vmul.f32 %v220_v22, %v220_v22  ;;  %v225_v27 = vmul.f32 %v221_v23, %v221_v23  ;;  %v226_v31 = vmul.f32 %v222_v26, %v222_v26 }
  0x4b   : > { %v227_v28 = vsel %vm210_vm0, %v223_v24, 0.0  ;;  %v228_v29 = vsel %vm210_vm0, %v224_v25, 0.0  ;;  %v230_v32 = vsel %vm210_vm0, %v225_v27, 0.0  ;;  %v232_v34 = vsel %vm210_vm0, %v226_v31, 0.0 }
  0x4c   : > { %v229_v30 = vadd.f32 %v228_v29, %v227_v28 }
  0x4e   : > { %v231_v33 = vadd.f32 %v230_v32, %v229_v30 }
  0x50   : > { %v233_v35 = vadd.f32 %v232_v34, %v231_v33 }
  0x52   : > { %v234_v36 = vmul.f32 0.25, %v233_v35 }
  0x54   : > { %v235_v37 = vadd.f32 1e-05, %v234_v36 }
  0x56   : > { %527 = vrsqrt.f32 %v235_v37 }
  0x60   : > { %v528_v38 = vpop.eup %527 }
  0x61   : > { %v237_v41 = vmul.f32 %v528_v38, %v219_v21  ;;  %v238_v42 = vmul.f32 %v528_v38, %v220_v22  ;;  %v239_v45 = vmul.f32 %v528_v38, %v221_v23  ;;  %v240_v47 = vmul.f32 %v528_v38, %v222_v26 }
  0xbb   : > { %v275_v39 = vpop.permute.xlu1 %274  ;;  %v267_v40 = vpop.permute.xlu0 %266 }
  0xbc   : > { %v281_v46 = vmul.f32 %v267_v40, %v237_v41  ;;  %v283_v53 = vmul.f32 %v275_v39, %v239_v45 }
  0xbf   : > { %v279_v43 = vpop.permute.xlu1 %278  ;;  %v271_v44 = vpop.permute.xlu0 %270 }
  0xc0   : > { %v282_v48 = vmul.f32 %v271_v44, %v238_v42  ;;  %v284_v54 = vmul.f32 %v279_v43, %v240_v47 }
  0xc3   : > { %v315_v49 = vpop.permute.xlu1 %314  ;;  %v311_v50 = vpop.permute.xlu0 %310 }
  0xc4   : > { %v326_v51 = vadd.f32 %v315_v49, %v282_v48  ;;  %v325_v52 = vadd.f32 %v311_v50, %v281_v46 }
  0xc6   : > { %330 = vst [vmem:[%s205_s21 + $0x2] sm:$0x3] %v326_v51  ;;  %329 = vst [vmem:[%s205_s21] sm:$0x3] %v325_v52 }
  0xc7   : > { %v323_v55 = vpop.permute.xlu1 %322  ;;  %v319_v56 = vpop.permute.xlu0 %318 }
  0xc8   : > { %v328_v57 = vadd.f32 %v323_v55, %v284_v54  ;;  %v327_v58 = vadd.f32 %v319_v56, %v283_v53 }
  0xca   : > { %332 = vst [vmem:[%s205_s21 + $0x6] sm:$0x3] %v328_v57  ;;  %331 = vst [vmem:[%s205_s21 + $0x4] sm:$0x3] %v327_v58 }
  0xcb   : > { %572 = shalt.err (!%p569_p5)
}
  0xcc   : > { %s573_s4 = scalar_lea.hbm %s832_s23, 128  ;;  %s577_s19 = scalar_lea.hbm %s884_s3, 256 }
  0xcd   : > { %p574_p4 = scmp.ne.s32.totalorder %s832_s23, %s573_s4  ;;  %p578_p12 = scmp.lt.u32.totalorder %s832_s23, %s884_s3 }
  0xce   : > { %p579_p1 = scmp.lt.u32.totalorder %s577_s19, %s573_s4  ;;  %p581_p8 = scmp.lt.u32.totalorder %s573_s4, %s832_s23 }
  0xcf   : > { %p575_p7 = pnand %p574_p4, %p892_p9 }
  0xd0   : > { %p580_p3 = por %p579_p1, %p578_p12 }
  0xd1   : > { %p576_p10 = pneg %p575_p7 }
  0xd2   : > { %p582_p11 = por %p581_p8, %p580_p3 }
  0xd4   : > { %p583_p0 = pnand %p582_p11, %p576_p10 }
  0xd6   : > { %586 = shalt.err (!%p583_p0)
}
  0xd7   : > { %s648_s21 = smov 32   ;;  %s649_s10 = smov 2  }
  0xd8   : > { %460 = dma.vmem_to_hbm [thread:$0]  (%p892_p9), %s827_s9, 128, %s832_s23, %s334_s15, %s648_s21, %s648_s21, %s649_s10  }
  0xd9 PF: > { %s363_s18 = sand.u32 1, %s621_s12   ;;  %p893_p6 = scmp.ne.s32.totalorder %s889_s27, 0 }
  0xda   : > { %p894_p13 = scmp.ge.s32.totalorder %s641_s17, 2  ;;  %s364_s22 = scalar_lea.sflag [#allocation4], %s363_s18 }
  0xdc   : > { %p467_p2 = pnand %p894_p13, %p893_p6 }
  0xde   : > { %616 = dma.done.wait (!%p467_p2), %s364_s22, 128  }
  0xdf   : > { %618 = vsyncadd (!%p467_p2), %s364_s22, 4294967168  ;;  %s19_s17 = sadd.s32 1, %s641_s17   ;;  %s895_s12 = smov %s625_s13 }
  0xe0   : > { %p16_p5 = scmp.ge.s32.totalorder %s19_s17, 4   ;;  %s896_s13 = smov %s629_s14 }
  0xe1   : > { %s897_s14 = smov %s726_s26  ;;  %s898_s15 = smov %s637_s16 }
  0xe2   : > { %s899_s16 = smov %s901_s20  ;;  %18 = sbr.rel (!%p16_p5) target bundleno = 6 (0x6), region = 77 }
  0xe9   :  { %369 = vsyncpa [#allocation3], 1 }
  0xea   :  { %371 = vsyncpa [#allocation3 + $0x1], 1 }
  0xeb   :  { %372 = vsyncpa [#allocation4], 1 }
  0xec   :  { %374 = vsyncpa [#allocation4 + $0x1], 1 }

</bundles_post_ra>
